<compile_context>
chip_gen: v6e
topology: v6e:2x2x1
jax: 0.10.0
libtpu: 0.0.40
codegen_flags: <defaults>
</compile_context>

<pallas_src>
import jax
import jax.numpy as jnp
from jax import lax
from jax.experimental import pallas as pl
from jax.experimental.pallas import tpu as pltpu


def gcn_kernel(x_ref, w1_ref, b1_ref, w2_ref, o_ref):
    # x_ref: (bt, S, N), w1_ref: (N, N), b1_ref: (1, N), w2_ref: (S, S)
    bt, S, N = x_ref.shape
    x = x_ref[...]                                   # (bt, S, N) f32
    w1 = w1_ref[...]                                 # (N, N)
    b1 = b1_ref[...]                                 # (1, N)
    w2 = w2_ref[...]                                 # (S, S)

    # conv1 over all batches in one MXU contraction (no explicit transpose):
    # h2[r, n] = sum_m x2[r, m] * W1[n, m]
    x2 = x.reshape(bt * S, N)                        # free: S is a multiple of 8
    h2 = lax.dot_general(
        x2, w1,
        dimension_numbers=(((1,), (1,)), ((), ())),
        preferred_element_type=jnp.float32,
    )                                                # (bt*S, N)

    # bias + residual + ReLU, all in f32.
    h2 = jnp.maximum(h2 + b1 + x2, 0.0)
    h = h2.reshape(bt, S, N)

    # conv2: out[b] = W2 @ h[b]; static unroll over the small batch tile.
    for b in range(bt):
        o_ref[b] = jnp.dot(
            w2, h[b], preferred_element_type=jnp.float32
        ).astype(o_ref.dtype)


def gcn_forward(x, w1, b1, w2, *, batch_tile=None):
    """x: (B, num_state, num_node) float32.

    batch_tile: how many batches per grid step.  Defaults to the full batch
    (single grid step), which is optimal at small B; at production sizes pick a
    tile that keeps VMEM happy and leaves >1 grid step for v7x's 2 TensorCores.
    """
    B, S, N = x.shape
    if batch_tile is None or batch_tile >= B:
        batch_tile = B
    assert B % batch_tile == 0, "batch_tile must divide B"
    grid = (B // batch_tile,)

    b1_2d = b1.reshape(1, N)

    return pl.pallas_call(
        gcn_kernel,
        out_shape=jax.ShapeDtypeStruct((B, S, N), x.dtype),
        grid_spec=pltpu.PrefetchScalarGridSpec(
            num_scalar_prefetch=0,
            grid=grid,
            in_specs=[
                pl.BlockSpec((batch_tile, S, N), lambda i: (i, 0, 0)),
                pl.BlockSpec((N, N), lambda i: (0, 0)),
                pl.BlockSpec((1, N), lambda i: (0, 0)),
                pl.BlockSpec((S, S), lambda i: (0, 0)),
            ],
            out_specs=pl.BlockSpec((batch_tile, S, N), lambda i: (i, 0, 0)),
        ),
        compiler_params=pltpu.CompilerParams(
            dimension_semantics=("parallel",),
        ),
    )(x, w1, b1_2d, w2)


def gcn_reference(x, w1, b1, w2):
    # Pure-JAX reference mirroring the PyTorch forward.
    h = jnp.einsum("bsm,nm->bsn", x, w1) + b1[None, None, :]
    h = jnp.maximum(h + x, 0.0)
    out = jnp.einsum("st,btn->bsn", w2, h)
    return out


if __name__ == "__main__":
    B = 2           # batch
    num_state = 32  # channels of x (state dim)
    num_node = 16   # nodes (spatial dim of the Conv1d inputs)

    key = jax.random.PRNGKey(0)
    kx, kw1, kb1, kw2 = jax.random.split(key, 4)

    x = jax.random.normal(kx, (B, num_state, num_node), dtype=jnp.float32)
    # conv1: nn.Conv1d(num_node, num_node, kernel_size=1) -> weight (N, N), bias (N,)
    w1 = jax.random.normal(kw1, (num_node, num_node), dtype=jnp.float32) * 0.1
    b1 = jax.random.normal(kb1, (num_node,), dtype=jnp.float32) * 0.1
    # conv2: nn.Conv1d(num_state, num_state, kernel_size=1, bias=False) -> weight (S, S)
    w2 = jax.random.normal(kw2, (num_state, num_state), dtype=jnp.float32) * 0.1

    out = gcn_forward(x, w1, b1, w2)
    out = jax.block_until_ready(out)

    ref = gcn_reference(x, w1, b1, w2)
    assert out.shape == (B, num_state, num_node)
    assert jnp.allclose(out, ref, atol=1e-4, rtol=1e-4), "mismatch vs reference"

    print("KERNEL_OK")
</pallas_src>

<mosaic_0001>
module attributes {stable_mosaic.version = 11 : i64} {
  func.func @gcn_kernel(%arg0: i32, %arg1: memref<2x32x16xf32, #tpu.memory_space<vmem>>, %arg2: memref<16x16xf32, #tpu.memory_space<vmem>>, %arg3: memref<1x16xf32, #tpu.memory_space<vmem>>, %arg4: memref<32x32xf32, #tpu.memory_space<vmem>>, %arg5: memref<2x32x16xf32, #tpu.memory_space<vmem>>) attributes {dimension_semantics = [#tpu.dimension_semantics<parallel>], iteration_bounds = array<i64: 1>, scalar_prefetch = 0 : i64, scratch_operands = 0 : i64, tpu.core_type = #tpu.core_type<tc>, window_params = [{transform_indices = @transform_0, window_bounds = array<i64: 2, 32, 16>}, {pipeline_mode = #tpu.pipeline_mode<synchronous>, transform_indices = @transform_1, window_bounds = array<i64: 16, 16>}, {pipeline_mode = #tpu.pipeline_mode<synchronous>, transform_indices = @transform_2, window_bounds = array<i64: 1, 16>}, {pipeline_mode = #tpu.pipeline_mode<synchronous>, transform_indices = @transform_3, window_bounds = array<i64: 32, 32>}, {transform_indices = @transform_4, window_bounds = array<i64: 2, 32, 16>}]} {
    %c0 = arith.constant 0 : index
    %c0_0 = arith.constant 0 : index
    %c0_1 = arith.constant 0 : index
    %0 = vector.load %arg1[%c0, %c0_0, %c0_1] : memref<2x32x16xf32, #tpu.memory_space<vmem>>, vector<2x32x16xf32>
    %c0_2 = arith.constant 0 : index
    %c0_3 = arith.constant 0 : index
    %1 = vector.load %arg2[%c0_2, %c0_3] : memref<16x16xf32, #tpu.memory_space<vmem>>, vector<16x16xf32>
    %c0_4 = arith.constant 0 : index
    %c0_5 = arith.constant 0 : index
    %2 = vector.load %arg3[%c0_4, %c0_5] : memref<1x16xf32, #tpu.memory_space<vmem>>, vector<1x16xf32>
    %c0_6 = arith.constant 0 : index
    %c0_7 = arith.constant 0 : index
    %3 = vector.load %arg4[%c0_6, %c0_7] : memref<32x32xf32, #tpu.memory_space<vmem>>, vector<32x32xf32>
    %4 = vector.shape_cast %0 : vector<2x32x16xf32> to vector<64x16xf32>
    %cst = arith.constant dense<0.000000e+00> : vector<64x16xf32>
    %5 = tpu.matmul %4, %1, %cst {dimension_numbers = #tpu.dot_dimension_numbers<[1], [1], [0], [0], [0, 0, 1, 0], [], []>} : vector<64x16xf32>, vector<16x16xf32>, vector<64x16xf32> -> vector<64x16xf32>
    %6 = vector.broadcast %2 : vector<1x16xf32> to vector<64x16xf32>
    %7 = arith.addf %5, %6 : vector<64x16xf32>
    %8 = arith.addf %7, %4 : vector<64x16xf32>
    %cst_8 = arith.constant 0.000000e+00 : f32
    %9 = vector.broadcast %cst_8 : f32 to vector<64x16xf32>
    %10 = arith.maximumf %8, %9 : vector<64x16xf32>
    %11 = vector.shape_cast %10 : vector<64x16xf32> to vector<2x32x16xf32>
    %12 = vector.extract_strided_slice %11 {offsets = [0, 0, 0], sizes = [1, 32, 16], strides = [1, 1, 1]} : vector<2x32x16xf32> to vector<1x32x16xf32>
    %13 = vector.shape_cast %12 : vector<1x32x16xf32> to vector<32x16xf32>
    %cst_9 = arith.constant dense<0.000000e+00> : vector<32x16xf32>
    %14 = tpu.matmul %3, %13, %cst_9 {dimension_numbers = #tpu.dot_dimension_numbers<[1], [0], [0], [1], [0, 0, 1, 1], [], []>} : vector<32x32xf32>, vector<32x16xf32>, vector<32x16xf32> -> vector<32x16xf32>
    %c0_10 = arith.constant 0 : index
    %c0_11 = arith.constant 0 : index
    %c0_12 = arith.constant 0 : index
    %15 = vector.load %arg5[%c0_10, %c0_11, %c0_12] : memref<2x32x16xf32, #tpu.memory_space<vmem>>, vector<1x32x16xf32>
    %16 = vector.shape_cast %15 : vector<1x32x16xf32> to vector<32x16xf32>
    %17 = vector.shape_cast %14 : vector<32x16xf32> to vector<1x32x16xf32>
    tpu.vector_store %arg5[%c0_10, %c0_11, %c0_12], %17 {strides = array<i32>} : memref<2x32x16xf32, #tpu.memory_space<vmem>>, vector<1x32x16xf32>,
    %18 = vector.extract_strided_slice %11 {offsets = [1, 0, 0], sizes = [1, 32, 16], strides = [1, 1, 1]} : vector<2x32x16xf32> to vector<1x32x16xf32>
    %19 = vector.shape_cast %18 : vector<1x32x16xf32> to vector<32x16xf32>
    %cst_13 = arith.constant dense<0.000000e+00> : vector<32x16xf32>
    %20 = tpu.matmul %3, %19, %cst_13 {dimension_numbers = #tpu.dot_dimension_numbers<[1], [0], [0], [1], [0, 0, 1, 1], [], []>} : vector<32x32xf32>, vector<32x16xf32>, vector<32x16xf32> -> vector<32x16xf32>
    %c1 = arith.constant 1 : index
    %c0_14 = arith.constant 0 : index
    %c0_15 = arith.constant 0 : index
    %21 = vector.load %arg5[%c1, %c0_14, %c0_15] : memref<2x32x16xf32, #tpu.memory_space<vmem>>, vector<1x32x16xf32>
    %22 = vector.shape_cast %21 : vector<1x32x16xf32> to vector<32x16xf32>
    %23 = vector.shape_cast %20 : vector<32x16xf32> to vector<1x32x16xf32>
    tpu.vector_store %arg5[%c1, %c0_14, %c0_15], %23 {strides = array<i32>} : memref<2x32x16xf32, #tpu.memory_space<vmem>>, vector<1x32x16xf32>,
    return
  }
  func.func @transform_0(%arg0: i32) -> (i32, i32, i32) {
    %c0_i32 = arith.constant 0 : i32
    %c0_i32_0 = arith.constant 0 : i32
    %c0_i32_1 = arith.constant 0 : i32
    return %arg0, %c0_i32, %c0_i32_0 : i32, i32, i32
  }
  func.func @transform_1(%arg0: i32) -> (i32, i32) {
    %c0_i32 = arith.constant 0 : i32
    %c0_i32_0 = arith.constant 0 : i32
    %c0_i32_1 = arith.constant 0 : i32
    return %c0_i32, %c0_i32_0 : i32, i32
  }
  func.func @transform_2(%arg0: i32) -> (i32, i32) {
    %c0_i32 = arith.constant 0 : i32
    %c0_i32_0 = arith.constant 0 : i32
    %c0_i32_1 = arith.constant 0 : i32
    return %c0_i32, %c0_i32_0 : i32, i32
  }
  func.func @transform_3(%arg0: i32) -> (i32, i32) {
    %c0_i32 = arith.constant 0 : i32
    %c0_i32_0 = arith.constant 0 : i32
    %c0_i32_1 = arith.constant 0 : i32
    return %c0_i32, %c0_i32_0 : i32, i32
  }
  func.func @transform_4(%arg0: i32) -> (i32, i32, i32) {
    %c0_i32 = arith.constant 0 : i32
    %c0_i32_0 = arith.constant 0 : i32
    %c0_i32_1 = arith.constant 0 : i32
    return %arg0, %c0_i32, %c0_i32_0 : i32, i32, i32
  }
}

</mosaic_0001>

<bundles_post_ra>
// kernel: tpu_custom_call.1
= control target key start
LH: loop header
LB: loop body
LE: loop exit
PB: predicated region body
PF: predicated region fallthrough
CT: control target
= control target key end

     0   :  { %vm38_vm0 = vcmask 130048   ;;  %vm190_vm1 = vcmask 261120   ;;  %s601_s1 = inlined_call_operand.vmem [shape: f32[16,16], index: 1, kind: input, shape index: {}]   ;;  %s602_s0 = inlined_call_operand.vmem [shape: f32[2,32,16], index: 0, kind: input, shape index: {}]   ;;  %s603_s3 = inlined_call_operand.vmem [shape: f32[32,32], index: 3, kind: input, shape index: {}]   ;;  %s604_s2 = inlined_call_operand.vmem [shape: f32[1,16], index: 2, kind: input, shape index: {}]   ;;  %s605_s4 = inlined_call_operand.vmem [shape: f32[2,32,16], index: 4, kind: output, shape index: {}]  }
   0x1   :  { %v25_v0 = vld [vmem:[%s601_s1] sm:$0xff]  ;;  %v26_v1 = vld [vmem:[%s601_s1 + $0x8] sm:$0xff]  ;;  %v19_v4 = vld [vmem:[%s602_s0 + $0x10] sm:$0xff] }
   0x2   :  { %v17_v2 = vld [vmem:[%s602_s0] sm:$0xff]  ;;  %435 = vmatprep.subr.msk.mxu0 %vm38_vm0, %v26_v1  ;;  %v18_v3 = vld [vmem:[%s602_s0 + $0x8] sm:$0xff]  ;;  %v20_v5 = vld [vmem:[%s602_s0 + $0x18] sm:$0xff] }
   0x3   :  { %439 = vmatprep.mubr.msk.f32.mxu0 %vm38_vm0, %v17_v2  ;;  %436 = vmatpush3.xpose.msk.msra.mxu0 %vm38_vm0, %v26_v1  ;;  %v21_v6 = vld [vmem:[%s602_s0 + $0x20] sm:$0xff]  ;;  %v22_v7 = vld [vmem:[%s602_s0 + $0x28] sm:$0xff]  ;;  %v23_v8 = vld [vmem:[%s602_s0 + $0x30] sm:$0xff] }
   0x4   :  { %437 = vmatprep.subr.msk.mxu0 %vm38_vm0, %v25_v0  ;;  %v24_v9 = vld [vmem:[%s602_s0 + $0x38] sm:$0xff]  ;;  %v28_v10 = vld [vmem:[%s603_s3] sm:$0xff]  ;;  %v29_v37 = vld [vmem:[%s603_s3 + $0x8] sm:$0xff] }
   0x5   :  { %459 = vmatprep.mubr.msk.f32.mxu1 %vm190_vm1, %v28_v10  ;;  %v386_v12 = vld [vmem:[%s604_s2] ss:$0 sm:$0xff]  ;;  %v30_v41 = vld [vmem:[%s603_s3 + $0x10] sm:$0xff]  ;;  %v31_v44 = vld [vmem:[%s603_s3 + $0x18] sm:$0xff] }
   0x7   :  { %438 = vmatpush3.xpose.msk.msra.mxu0 %vm38_vm0, %v25_v0 }
   0xa   :  { %440 = vmatmul.mubr.msk.f32.vlgmr.msra.gmra.mxu0 %vm38_vm0, %v18_v3 }
   0xb   :  { %442 = vmatprep.mubr.msk.f32.mxu0 %vm38_vm0, %v19_v4 }
   0xe   :  { %443 = vmatmul.mubr.msk.f32.gmra.mxu0 %vm38_vm0, %v20_v5 }
   0xf   :  { %445 = vmatprep.mubr.msk.f32.mxu0 %vm38_vm0, %v21_v6 }
  0x12   :  { %446 = vmatmul.mubr.msk.f32.gmra.mxu0 %vm38_vm0, %v22_v7 }
  0x13   :  { %448 = vmatprep.mubr.msk.f32.mxu0 %vm38_vm0, %v23_v8 }
  0x16   :  { %449 = vmatmul.mubr.msk.f32.gmra.mxu0 %vm38_vm0, %v24_v9 }
  0xca   :  { %v441_v11 = vpop.f32.mrf.mxu0 }
  0xcb   :  { %v141_v15 = vadd.f32 %v441_v11, %v386_v12 }
  0xcc   :  { %v135_v13 = vpop.f32.mrf.mxu0 }
  0xcd   :  { %v136_v18 = vadd.f32 %v386_v12, %v135_v13  ;;  %v175_v22 = vadd.f32 %v141_v15, %v18_v3 }
  0xce   :  { %v444_v14 = vpop.f32.mrf.mxu0 }
  0xcf   :  { %v151_v16 = vadd.f32 %v444_v14, %v386_v12  ;;  %v174_v26 = vadd.f32 %v136_v18, %v17_v2  ;;  %v183_v29 = vmax.f32 %v175_v22, 0.0 }
  0xd0   :  { %v145_v17 = vpop.f32.mrf.mxu0 }
  0xd1   :  { %v146_v19 = vadd.f32 %v386_v12, %v145_v17  ;;  %v177_v20 = vadd.f32 %v151_v16, %v20_v5  ;;  %v182_v33 = vmax.f32 %v174_v26, 0.0 }
  0xd2   :  { %v447_v21 = vpop.f32.mrf.mxu0 }
  0xd3   :  { %v176_v23 = vadd.f32 %v146_v19, %v19_v4  ;;  %v185_v24 = vmax.f32 %v177_v20, 0.0  ;;  %v161_v30 = vadd.f32 %v447_v21, %v386_v12 }
  0xd4   :  { %v155_v25 = vpop.f32.mrf.mxu0 }
  0xd5   :  { %v184_v27 = vmax.f32 %v176_v23, 0.0  ;;  %451 = vmatprep.subr.mxu1 %v185_v24  ;;  %v156_v34 = vadd.f32 %v386_v12, %v155_v25  ;;  %v179_v38 = vadd.f32 %v161_v30, %v22_v7 }
  0xd6   :  { %v450_v28 = vpop.f32.mrf.mxu0  ;;  %452 = vmatpush3.msra.mxu1 %v185_v24 }
  0xd7   :  { %v171_v31 = vadd.f32 %v450_v28, %v386_v12  ;;  %453 = vmatprep.subr.mxu1 %v184_v27  ;;  %v178_v42 = vadd.f32 %v156_v34, %v21_v6  ;;  %v187_v45 = vmax.f32 %v179_v38, 0.0 }
  0xd8   :  { %v165_v32 = vpop.f32.mrf.mxu0  ;;  %454 = vmatpush3.msra.mxu1 %v184_v27 }
  0xd9   :  { %v181_v35 = vadd.f32 %v171_v31, %v24_v9  ;;  %v166_v36 = vadd.f32 %v386_v12, %v165_v32  ;;  %455 = vmatprep.subr.mxu1 %v183_v29  ;;  %v186_v46 = vmax.f32 %v178_v42, 0.0 }
  0xda   :  { %456 = vmatpush3.msra.mxu1 %v183_v29 }
  0xdb   :  { %v189_v39 = vmax.f32 %v181_v35, 0.0  ;;  %v180_v40 = vadd.f32 %v166_v36, %v23_v8  ;;  %457 = vmatprep.subr.mxu1 %v182_v33 }
  0xdc   :  { %458 = vmatpush3.msra.mxu1 %v182_v33 }
  0xdd   :  { %v188_v43 = vmax.f32 %v180_v40, 0.0  ;;  %460 = vmatmul.mubr.msk.f32.vlgmr.msra.gmra.mxu1 %vm190_vm1, %v29_v37  ;;  %465 = vmatprep.subr.mxu1 %v189_v39 }
  0xde   :  { %466 = vmatpush3.msra.mxu1 %v189_v39  ;;  %462 = vmatprep.mubr.msk.f32.mxu1 %vm190_vm1, %v30_v41 }
  0xdf   :  { %467 = vmatprep.subr.mxu1 %v188_v43 }
  0xe0   :  { %468 = vmatpush3.msra.mxu1 %v188_v43 }
  0xe1   :  { %463 = vmatmul.mubr.msk.f32.gmra.mxu1 %vm190_vm1, %v31_v44  ;;  %469 = vmatprep.subr.mxu1 %v187_v45 }
  0xe2   :  { %470 = vmatpush3.msra.mxu1 %v187_v45  ;;  %473 = vmatprep.mubr.msk.f32.mxu1 %vm190_vm1, %v28_v10 }
  0xe3   :  { %471 = vmatprep.subr.mxu1 %v186_v46 }
  0xe4   :  { %472 = vmatpush3.msra.mxu1 %v186_v46 }
  0xe5   :  { %474 = vmatmul.mubr.msk.f32.vlgmr.msra.gmra.mxu1 %vm190_vm1, %v29_v37 }
  0xe6   :  { %476 = vmatprep.mubr.msk.f32.mxu1 %vm190_vm1, %v30_v41 }
  0xe9   :  { %477 = vmatmul.mubr.msk.f32.gmra.mxu1 %vm190_vm1, %v31_v44 }
 0x19d   :  { %v461_v47 = vpop.f32.mrf.mxu1 }
 0x19e   :  { %289 = vst.msk [vmem:[%s605_s4 + $0x8] sm:$0xff] %vm38_vm0, %v461_v47 }
 0x19f   :  { %v269_v48 = vpop.f32.mrf.mxu1 }
 0x1a0   :  { %288 = vst.msk [vmem:[%s605_s4] sm:$0xff] %vm38_vm0, %v269_v48 }
 0x1a1   :  { %v464_v49 = vpop.f32.mrf.mxu1 }
 0x1a2   :  { %291 = vst.msk [vmem:[%s605_s4 + $0x18] sm:$0xff] %vm38_vm0, %v464_v49 }
 0x1a3   :  { %v279_v50 = vpop.f32.mrf.mxu1 }
 0x1a4   :  { %290 = vst.msk [vmem:[%s605_s4 + $0x10] sm:$0xff] %vm38_vm0, %v279_v50 }
 0x1a5   :  { %v475_v51 = vpop.f32.mrf.mxu1 }
 0x1a6   :  { %406 = vst.msk [vmem:[%s605_s4 + $0x28] sm:$0xff] %vm38_vm0, %v475_v51 }
 0x1a7   :  { %v358_v52 = vpop.f32.mrf.mxu1 }
 0x1a8   :  { %405 = vst.msk [vmem:[%s605_s4 + $0x20] sm:$0xff] %vm38_vm0, %v358_v52 }
 0x1a9   :  { %v478_v53 = vpop.f32.mrf.mxu1 }
 0x1aa   :  { %408 = vst.msk [vmem:[%s605_s4 + $0x38] sm:$0xff] %vm38_vm0, %v478_v53 }
 0x1ab   :  { %v368_v54 = vpop.f32.mrf.mxu1 }
 0x1ac   :  { %407 = vst.msk [vmem:[%s605_s4 + $0x30] sm:$0xff] %vm38_vm0, %v368_v54 }

</bundles_post_ra>
